<compile_context>
chip_gen: v6e
topology: v6e:2x2x1
jax: 0.10.0
libtpu: 0.0.40
codegen_flags: <defaults>
</compile_context>

<pallas_src>
import math
from functools import partial

import jax
import jax.numpy as jnp
from jax.experimental import pallas as pl
from jax.experimental.pallas import tpu as pltpu


def _round_up(x, m):
    return ((x + m - 1) // m) * m


def _pad2d(a, rows, cols):
    r, c = a.shape
    if r == rows and c == cols:
        return a
    return jnp.pad(a, ((0, rows - r), (0, cols - c)))


def decay_kernel(rgate_ref, x_ref, w_ref, b_ref, hx_ref, o_ref, *, activation):
    # rgate_ref: (1,) f32 scalar, prefetched into SMEM
    # x_ref:   (tm, tk)  activation tile (batch, input)
    # w_ref:   (tk, tn)  weight_ih.T tile (input, hidden)
    # b_ref:   (1, tn)   bias tile
    # hx_ref:  (1, tn)   hidden-state tile (zeros when hx is None)
    # o_ref:   (tm, tn)  output tile (f32) -- doubles as the accumulator since
    #          its block index is constant along k (stays resident in VMEM).
    k = pl.program_id(2)

    @pl.when(k == 0)
    def _init():
        # Seed the accumulator with the bias (fuses the bias add into init).
        o_ref[...] = jnp.broadcast_to(b_ref[...], o_ref.shape)

    o_ref[...] += jnp.dot(x_ref[...], w_ref[...],
                          preferred_element_type=jnp.float32)

    @pl.when(k == pl.num_programs(2) - 1)
    def _finalize():
        r = rgate_ref[0]
        w_x = o_ref[...]                         # bias + x @ w^T
        w_w = w_x + r * (hx_ref[...] - w_x)      # == r*hx + (1-r)*w_x
        if activation == "tanh":
            h = jnp.tanh(w_w)
        else:
            h = jnp.maximum(w_w, 0.0)            # ReLU
        o_ref[...] = h


def decay_module_forward(x_bi, weight_ih_t, bias_ih, rgate, hx=None, *,
                         activation="relu", tm=256, tn=256, tk=256):
    """DecayModule forward.

    x_bi:        (batch, input_size) float32 — activation in row-major (B, I)
                 layout (the PyTorch module takes (input_size, batch); transpose
                 once at the boundary, or better, emit (B, I) from the producer).
    weight_ih_t: (input_size, hidden) = weight_ih.T, pre-transposed ONCE at setup.
    bias_ih:     (hidden,)
    rgate:       scalar decay gate (trainable parameter, passed at runtime)
    hx:          (hidden,) or None (zeros)
    Returns (batch, hidden) float32.
    """
    B, I = x_bi.shape
    I2, H = weight_ih_t.shape
    assert I == I2, (I, I2)
    if hx is None:
        hx = jnp.zeros((H,), dtype=jnp.float32)

    # Clamp tiles to the (padded) problem size.
    #   second-to-last dims: multiple of 8; last dims: multiple of 128 (lane-dense).
    tm = min(tm, _round_up(B, 8))
    tk = min(tk, _round_up(I, 128))
    tn = min(tn, _round_up(H, 128))
    B_pad = _round_up(B, tm)
    I_pad = _round_up(I, tk)
    H_pad = _round_up(H, tn)

    # Zero padding: extra I columns contribute 0 to the dot; extra B rows / H
    # columns are sliced off below.  _pad2d is a no-op for aligned shapes.
    x_p = _pad2d(x_bi, B_pad, I_pad)
    w_p = _pad2d(weight_ih_t, I_pad, H_pad)
    b_p = _pad2d(bias_ih.reshape(1, H), 1, H_pad)
    hx_p = _pad2d(hx.reshape(1, H), 1, H_pad)
    rgate1 = jnp.asarray(rgate, jnp.float32).reshape(1)

    grid = (B_pad // tm, H_pad // tn, I_pad // tk)

    out = pl.pallas_call(
        partial(decay_kernel, activation=activation),
        out_shape=jax.ShapeDtypeStruct((B_pad, H_pad), jnp.float32),
        grid_spec=pltpu.PrefetchScalarGridSpec(
            num_scalar_prefetch=1,                       # rgate -> SMEM
            grid=grid,
            in_specs=[
                pl.BlockSpec((tm, tk), lambda i, j, k, rg: (i, k)),  # x
                pl.BlockSpec((tk, tn), lambda i, j, k, rg: (k, j)),  # w^T
                pl.BlockSpec((1, tn), lambda i, j, k, rg: (0, j)),   # bias
                pl.BlockSpec((1, tn), lambda i, j, k, rg: (0, j)),   # hx
            ],
            out_specs=pl.BlockSpec((tm, tn), lambda i, j, k, rg: (i, j)),
        ),
        compiler_params=pltpu.CompilerParams(
            # batch/hidden tiles are independent -> megacore-shardable on v7x;
            # k is the reduction axis (output block resident) -> arbitrary.
            dimension_semantics=("parallel", "parallel", "arbitrary"),
            # 256x256 f32 tiles (x, w, out; double-buffered inputs) stay well
            # under the 16/32 MiB scoped-VMEM defaults on v5e/v6e/v7x, so no
            # vmem_limit_bytes override is needed.
        ),
        cost_estimate=pl.CostEstimate(
            flops=2 * B_pad * I_pad * H_pad,
            transcendentals=(B_pad * H_pad if activation == "tanh" else 0),
            bytes_accessed=4 * (B_pad * I_pad + I_pad * H_pad
                                + B_pad * H_pad + 2 * H_pad),
        ),
    )(rgate1, x_p, w_p, b_p, hx_p)

    return out[:B, :H]  # (batch, hidden_size)


if __name__ == "__main__":
    input_size = 16
    hidden_size = 32
    num_chunks = 1
    batch = 8

    key = jax.random.PRNGKey(0)
    k_x, k_wih, k_bih, k_hx = jax.random.split(key, 4)

    # Deterministic parameter init mirroring reset_parameters():
    # uniform(-stdv, stdv) with stdv = 1/sqrt(hidden_size); rgate = 0.8.
    stdv = 1.0 / math.sqrt(hidden_size)
    weight_ih = jax.random.uniform(
        k_wih, (num_chunks * hidden_size, input_size),
        minval=-stdv, maxval=stdv, dtype=jnp.float32)
    bias_ih = jax.random.uniform(
        k_bih, (num_chunks * hidden_size,),
        minval=-stdv, maxval=stdv, dtype=jnp.float32)
    rgate = jnp.float32(0.8)
    # weight_hh / bias_hh / d_rec are parameters of the module but unused in forward().

    # Pre-transpose the weight ONCE at parameter setup (not in the hot path).
    weight_ih_t = weight_ih.T                     # (input_size, hidden)

    # PyTorch-layout example input (input_size, batch); transpose once at the
    # boundary to the lane-friendly (batch, input) layout the kernel consumes.
    x_ib = jax.random.normal(k_x, (input_size, batch), dtype=jnp.float32)
    x_bi = x_ib.T

    # --- Test 1: default path (relu, hx=None) ---
    out = decay_module_forward(x_bi, weight_ih_t, bias_ih, rgate, hx=None,
                               activation="relu")
    out = jax.block_until_ready(out)

    w_x_ref = bias_ih + (weight_ih @ x_ib).T
    hx0 = jnp.zeros((num_chunks * hidden_size,), jnp.float32)
    w_w_ref = rgate * hx0 + (1.0 - rgate) * w_x_ref
    ref = jnp.maximum(w_w_ref, 0.0)

    assert out.shape == (batch, num_chunks * hidden_size)
    assert jnp.allclose(out, ref, atol=1e-5, rtol=1e-5)

    # --- Test 2: tanh activation with a non-trivial hidden state ---
    hx1 = jax.random.normal(k_hx, (num_chunks * hidden_size,), dtype=jnp.float32)
    out2 = decay_module_forward(x_bi, weight_ih_t, bias_ih, rgate, hx=hx1,
                                activation="tanh")
    out2 = jax.block_until_ready(out2)

    w_w_ref2 = rgate * hx1 + (1.0 - rgate) * w_x_ref
    ref2 = jnp.tanh(w_w_ref2)

    assert out2.shape == (batch, num_chunks * hidden_size)
    assert jnp.allclose(out2, ref2, atol=1e-5, rtol=1e-5)

    print("KERNEL_OK")
</pallas_src>

<mosaic_0001>
module attributes {stable_mosaic.version = 11 : i64} {
  func.func @decay_kernel(%arg0: i32, %arg1: i32, %arg2: i32, %arg3: memref<1xf32, #tpu.memory_space<smem>>, %arg4: memref<8x128xf32, #tpu.memory_space<vmem>>, %arg5: memref<128x128xf32, #tpu.memory_space<vmem>>, %arg6: memref<1x128xf32, #tpu.memory_space<vmem>>, %arg7: memref<1x128xf32, #tpu.memory_space<vmem>>, %arg8: memref<8x128xf32, #tpu.memory_space<vmem>>) attributes {dimension_semantics = [#tpu.dimension_semantics<parallel>, #tpu.dimension_semantics<parallel>, #tpu.dimension_semantics<arbitrary>], iteration_bounds = array<i64: 1, 1, 1>, scalar_prefetch = 1 : i64, scratch_operands = 0 : i64, tpu.core_type = #tpu.core_type<tc>, window_params = [{transform_indices = @transform_0, window_bounds = array<i64: 8, 128>}, {transform_indices = @transform_1, window_bounds = array<i64: 128, 128>}, {transform_indices = @transform_2, window_bounds = array<i64: 1, 128>}, {transform_indices = @transform_3, window_bounds = array<i64: 1, 128>}, {transform_indices = @transform_4, window_bounds = array<i64: 8, 128>}]} {
    %c0_i32 = arith.constant 0 : i32
    %0 = arith.cmpi eq, %arg2, %c0_i32 : i32
    %1 = arith.extui %0 : i1 to i32
    %c0_i32_0 = arith.constant 0 : i32
    %2 = arith.cmpi ne, %1, %c0_i32_0 : i32
    scf.if %2 {
      %c0_10 = arith.constant 0 : index
      %c0_11 = arith.constant 0 : index
      %12 = vector.load %arg6[%c0_10, %c0_11] : memref<1x128xf32, #tpu.memory_space<vmem>>, vector<1x128xf32>
      %13 = vector.shape_cast %12 : vector<1x128xf32> to vector<1x128xf32>
      %14 = vector.broadcast %13 : vector<1x128xf32> to vector<8x128xf32>
      %c0_12 = arith.constant 0 : index
      %c0_13 = arith.constant 0 : index
      %15 = vector.load %arg8[%c0_12, %c0_13] : memref<8x128xf32, #tpu.memory_space<vmem>>, vector<8x128xf32>
      tpu.vector_store %arg8[%c0_12, %c0_13], %14 {strides = array<i32>} : memref<8x128xf32, #tpu.memory_space<vmem>>, vector<8x128xf32>,
    } else {
    }
    %c0 = arith.constant 0 : index
    %c0_1 = arith.constant 0 : index
    %3 = vector.load %arg8[%c0, %c0_1] : memref<8x128xf32, #tpu.memory_space<vmem>>, vector<8x128xf32>
    %c0_2 = arith.constant 0 : index
    %c0_3 = arith.constant 0 : index
    %4 = vector.load %arg4[%c0_2, %c0_3] : memref<8x128xf32, #tpu.memory_space<vmem>>, vector<8x128xf32>
    %c0_4 = arith.constant 0 : index
    %c0_5 = arith.constant 0 : index
    %5 = vector.load %arg5[%c0_4, %c0_5] : memref<128x128xf32, #tpu.memory_space<vmem>>, vector<128x128xf32>
    %cst = arith.constant dense<0.000000e+00> : vector<8x128xf32>
    %6 = tpu.matmul %4, %5, %cst {dimension_numbers = #tpu.dot_dimension_numbers<[1], [0], [0], [1], [0, 0, 1, 1], [], []>} : vector<8x128xf32>, vector<128x128xf32>, vector<8x128xf32> -> vector<8x128xf32>
    %7 = arith.addf %3, %6 : vector<8x128xf32>
    %c0_6 = arith.constant 0 : index
    %c0_7 = arith.constant 0 : index
    %8 = vector.load %arg8[%c0_6, %c0_7] : memref<8x128xf32, #tpu.memory_space<vmem>>, vector<8x128xf32>
    tpu.vector_store %arg8[%c0_6, %c0_7], %7 {strides = array<i32>} : memref<8x128xf32, #tpu.memory_space<vmem>>, vector<8x128xf32>,
    %c0_i32_8 = arith.constant 0 : i32
    %9 = arith.cmpi eq, %arg2, %c0_i32_8 : i32
    %10 = arith.extui %9 : i1 to i32
    %c0_i32_9 = arith.constant 0 : i32
    %11 = arith.cmpi ne, %10, %c0_i32_9 : i32
    scf.if %11 {
      %c0_10 = arith.constant 0 : index
      %12 = memref.load %arg3[%c0_10] : memref<1xf32, #tpu.memory_space<smem>>
      %c0_11 = arith.constant 0 : index
      %c0_12 = arith.constant 0 : index
      %13 = vector.load %arg8[%c0_11, %c0_12] : memref<8x128xf32, #tpu.memory_space<vmem>>, vector<8x128xf32>
      %c0_13 = arith.constant 0 : index
      %c0_14 = arith.constant 0 : index
      %14 = vector.load %arg7[%c0_13, %c0_14] : memref<1x128xf32, #tpu.memory_space<vmem>>, vector<1x128xf32>
      %15 = vector.broadcast %14 : vector<1x128xf32> to vector<8x128xf32>
      %16 = arith.subf %15, %13 : vector<8x128xf32>
      %17 = vector.broadcast %12 : f32 to vector<8x128xf32>
      %18 = arith.mulf %17, %16 : vector<8x128xf32>
      %19 = arith.addf %13, %18 : vector<8x128xf32>
      %cst_15 = arith.constant 0.000000e+00 : f32
      %20 = vector.broadcast %cst_15 : f32 to vector<8x128xf32>
      %21 = arith.maximumf %19, %20 : vector<8x128xf32>
      %c0_16 = arith.constant 0 : index
      %c0_17 = arith.constant 0 : index
      %22 = vector.load %arg8[%c0_16, %c0_17] : memref<8x128xf32, #tpu.memory_space<vmem>>, vector<8x128xf32>
      tpu.vector_store %arg8[%c0_16, %c0_17], %21 {strides = array<i32>} : memref<8x128xf32, #tpu.memory_space<vmem>>, vector<8x128xf32>,
    } else {
    }
    return
  }
  func.func @transform_0(%arg0: i32, %arg1: i32, %arg2: i32, %arg3: memref<1xf32, #tpu.memory_space<smem>>) -> (i32, i32) {
    %c0_i32 = arith.constant 0 : i32
    return %arg0, %arg2 : i32, i32
  }
  func.func @transform_1(%arg0: i32, %arg1: i32, %arg2: i32, %arg3: memref<1xf32, #tpu.memory_space<smem>>) -> (i32, i32) {
    %c0_i32 = arith.constant 0 : i32
    return %arg2, %arg1 : i32, i32
  }
  func.func @transform_2(%arg0: i32, %arg1: i32, %arg2: i32, %arg3: memref<1xf32, #tpu.memory_space<smem>>) -> (i32, i32) {
    %c0_i32 = arith.constant 0 : i32
    %c0_i32_0 = arith.constant 0 : i32
    return %c0_i32, %arg1 : i32, i32
  }
  func.func @transform_3(%arg0: i32, %arg1: i32, %arg2: i32, %arg3: memref<1xf32, #tpu.memory_space<smem>>) -> (i32, i32) {
    %c0_i32 = arith.constant 0 : i32
    %c0_i32_0 = arith.constant 0 : i32
    return %c0_i32, %arg1 : i32, i32
  }
  func.func @transform_4(%arg0: i32, %arg1: i32, %arg2: i32, %arg3: memref<1xf32, #tpu.memory_space<smem>>) -> (i32, i32) {
    %c0_i32 = arith.constant 0 : i32
    return %arg0, %arg1 : i32, i32
  }
}

</mosaic_0001>

<bundles_post_ra>
// kernel: tpu_custom_call.1
= control target key start
LH: loop header
LB: loop body
LE: loop exit
PB: predicated region body
PF: predicated region fallthrough
CT: control target
= control target key end

     0   :  { %11 = vsyncpa [#allocation5], 0  ;;  %s364_s0 = inlined_call_operand.<no memory space> [shape: f32[1], index: 0, kind: input, shape index: {}]   ;;  %s365_s1 = inlined_call_operand.hbm [shape: f32[8,128], index: 1, kind: input, shape index: {}]   ;;  %s366_s2 = inlined_call_operand.hbm [shape: f32[128,128], index: 2, kind: input, shape index: {}]   ;;  %s367_s3 = inlined_call_operand.vmem [shape: f32[1,128], index: 3, kind: input, shape index: {}]   ;;  %s368_s4 = inlined_call_operand.vmem [shape: f32[1,128], index: 4, kind: input, shape index: {}]   ;;  %s369_s5 = inlined_call_operand.hbm [shape: f32[8,128], index: 5, kind: output, shape index: {}]  }
   0x1   :  { %12 = vsyncpa [#allocation8], 0 }
   0x2   :  { %13 = vsyncpa [#allocation6], 0  ;;  %s309_s18 = smov [#allocation4]   ;;  %s310_s20 = smov [#allocation7]  }
   0x3   :  { %s20_s19 = sshll.u32 %s309_s18, 4  ;;  %s29_s21 = sshll.u32 %s310_s20, 4  ;;  %s21_s19 = int_to_ptr.vmem [resolvable:$true] %s20_s19  ;;  %s30_s21 = int_to_ptr.vmem [resolvable:$true] %s29_s21 }
   0x4   :  { %s251_s22 = scalar_lea.vmem %s21_s19, 128  ;;  %p256_p1 = scmp.lt.s32.totalorder %s21_s19, %s21_s19 }
   0x5   :  { %p252_p0 = scmp.ne.s32.totalorder %s21_s19, %s251_s22  ;;  %p257_p2 = scmp.lt.s32.totalorder %s251_s22, %s251_s22 }
   0x7   :  { %p258_p3 = por %p257_p2, %p256_p1 }
   0x9   :  { %p259_p4 = pnand %p258_p3, %p252_p0 }
   0xb   :  { %262 = shalt.err (!%p259_p4)
}
   0xc   :  { %23 = dma.hbm_to_vmem [thread:$0]  %s365_s1, 128, %s21_s19, [#allocation5]  }
   0xd   :  { %s271_s25 = scalar_lea.vmem %s30_s21, 2048  ;;  %p276_p6 = scmp.lt.s32.totalorder %s30_s21, %s30_s21 }
   0xe   :  { %p272_p5 = scmp.ne.s32.totalorder %s30_s21, %s271_s25  ;;  %p277_p7 = scmp.lt.s32.totalorder %s271_s25, %s271_s25 }
  0x10   :  { %p278_p8 = por %p277_p7, %p276_p6 }
  0x12   :  { %p279_p9 = pnand %p278_p8, %p272_p5 }
  0x14   :  { %282 = shalt.err (!%p279_p9)
}
  0x15   :  { %s311_s26 = smov 128   ;;  %s312_s27 = smov 8  }
  0x16   :  { %35 = dma.hbm_to_vmem [thread:$0]  %s366_s2, 2048, %s30_s21, [#allocation8], %s311_s26, %s311_s26, %s312_s27  }
  0x17   :  { %303 = dma.done.wait [#allocation5], 128  }
  0x18   :  { %304 = vsyncadd [#allocation5], 4294967168 }
  0x19   :  { %305 = dma.done.wait [#allocation8], 2048  }
  0x1a   :  { %306 = vsyncadd [#allocation8], 4294965248  ;;  %v313_v0 = vmov 0.0   ;;  %vm314_vm0 = vmmov 0   ;;  %v75_v1 = vld [vmem:[#allocation7 + $0x78] sm:$0xff]  ;;  %v74_v2 = vld [vmem:[#allocation7 + $0x70] sm:$0xff]  ;;  %v161_v23 = vstv %s364_s0 }
  0x1b   :  { %201 = vmatprep.subr.mxu0 %v313_v0  ;;  %233 = vmatprep.mubr.msk.f32.mxu0 %vm314_vm0, %v313_v0  ;;  %v73_v3 = vld [vmem:[#allocation7 + $0x68] sm:$0xff]  ;;  %v72_v4 = vld [vmem:[#allocation7 + $0x60] sm:$0xff]  ;;  %v71_v5 = vld [vmem:[#allocation7 + $0x58] sm:$0xff]  ;;  %s315_s9 = smov [#allocation9]  }
  0x1c   :  { %202 = vmatpush3.msra.mxu0 %v75_v1  ;;  %v70_v6 = vld [vmem:[#allocation7 + $0x50] sm:$0xff]  ;;  %v69_v7 = vld [vmem:[#allocation7 + $0x48] sm:$0xff]  ;;  %v68_v8 = vld [vmem:[#allocation7 + $0x40] sm:$0xff]  ;;  %s172_s10 = sshll.u32 %s315_s9, 4  ;;  %s173_s10 = int_to_ptr.vmem [resolvable:$true] %s172_s10 }
  0x1d   :  { %203 = vmatprep.subr.mxu0 %v313_v0  ;;  %v67_v9 = vld [vmem:[#allocation7 + $0x38] sm:$0xff]  ;;  %v66_v10 = vld [vmem:[#allocation7 + $0x30] sm:$0xff]  ;;  %v65_v11 = vld [vmem:[#allocation7 + $0x28] sm:$0xff]  ;;  %p288_p11 = scmp.lt.s32.totalorder %s173_s10, %s173_s10 }
  0x1e   :  { %204 = vmatpush3.msra.mxu0 %v74_v2  ;;  %v64_v12 = vld [vmem:[#allocation7 + $0x20] sm:$0xff]  ;;  %v63_v13 = vld [vmem:[#allocation7 + $0x18] sm:$0xff]  ;;  %v62_v14 = vld [vmem:[#allocation7 + $0x10] sm:$0xff] }
  0x1f   :  { %205 = vmatprep.subr.mxu0 %v313_v0  ;;  %v61_v15 = vld [vmem:[#allocation7 + $0x8] sm:$0xff]  ;;  %v60_v16 = vld [vmem:[#allocation7] sm:$0xff]  ;;  %v59_v17 = vld [vmem:[#allocation4] sm:$0xff] }
  0x20   :  { %206 = vmatpush3.msra.mxu0 %v73_v3  ;;  %v182_v18 = vld [vmem:[%s367_s3] ss:$0 sm:$0xff]  ;;  %s283_s3 = scalar_lea.vmem %s173_s10, 128 }
  0x21   :  { %207 = vmatprep.subr.mxu0 %v313_v0  ;;  %v183_v20 = vld [vmem:[%s368_s4] ss:$0 sm:$0xff]  ;;  %p284_p10 = scmp.ne.s32.totalorder %s173_s10, %s283_s3  ;;  %p289_p12 = scmp.lt.s32.totalorder %s283_s3, %s283_s3 }
  0x22   :  { %208 = vmatpush3.msra.mxu0 %v72_v4 }
  0x23   :  { %209 = vmatprep.subr.mxu0 %v313_v0  ;;  %p290_p13 = por %p289_p12, %p288_p11 }
  0x24   :  { %210 = vmatpush3.msra.mxu0 %v71_v5 }
  0x25   :  { %211 = vmatprep.subr.mxu0 %v313_v0  ;;  %p291_p0 = pnand %p290_p13, %p284_p10 }
  0x26   :  { %212 = vmatpush3.msra.mxu0 %v70_v6 }
  0x27   :  { %213 = vmatprep.subr.mxu0 %v313_v0 }
  0x28   :  { %214 = vmatpush3.msra.mxu0 %v69_v7 }
  0x29   :  { %215 = vmatprep.subr.mxu0 %v313_v0 }
  0x2a   :  { %216 = vmatpush3.msra.mxu0 %v68_v8 }
  0x2b   :  { %217 = vmatprep.subr.mxu0 %v313_v0 }
  0x2c   :  { %218 = vmatpush3.msra.mxu0 %v67_v9 }
  0x2d   :  { %219 = vmatprep.subr.mxu0 %v313_v0 }
  0x2e   :  { %220 = vmatpush3.msra.mxu0 %v66_v10 }
  0x2f   :  { %221 = vmatprep.subr.mxu0 %v313_v0 }
  0x30   :  { %222 = vmatpush3.msra.mxu0 %v65_v11 }
  0x31   :  { %223 = vmatprep.subr.mxu0 %v313_v0 }
  0x32   :  { %224 = vmatpush3.msra.mxu0 %v64_v12 }
  0x33   :  { %225 = vmatprep.subr.mxu0 %v313_v0 }
  0x34   :  { %226 = vmatpush3.msra.mxu0 %v63_v13 }
  0x35   :  { %227 = vmatprep.subr.mxu0 %v313_v0 }
  0x36   :  { %228 = vmatpush3.msra.mxu0 %v62_v14 }
  0x37   :  { %229 = vmatprep.subr.mxu0 %v313_v0 }
  0x38   :  { %230 = vmatpush3.msra.mxu0 %v61_v15 }
  0x39   :  { %231 = vmatprep.subr.mxu0 %v313_v0 }
  0x3a   :  { %232 = vmatpush3.msra.mxu0 %v60_v16 }
  0x3b   :  { %234 = vmatmul.mubr.f32.vlgmr.msra.gmra.mxu0 %v59_v17 }
  0xfb   :  { %v142_v19 = vpop.f32.mrf.mxu0 }
  0xfc   :  { %v146_v21 = vadd.f32 %v182_v18, %v142_v19 }
  0xfd   :  { %v235_v22 = vpop.f32.mrf.mxu0 }
  0xfe   :  { %v160_v24 = vsub.f32 %v183_v20, %v146_v21 }
 0x100   :  { %v162_v25 = vmul.f32 %v161_v23, %v160_v24 }
 0x102   :  { %v163_v26 = vadd.f32 %v162_v25, %v146_v21 }
 0x104   :  { %v164_v27 = vmax.f32 %v163_v26, 0.0 }
 0x106   :  { %165 = vst [vmem:[#allocation9] sm:$0xff] %v164_v27 }
 0x107   :  { %294 = shalt.err (!%p291_p0)
}
 0x108   :  { %175 = dma.vmem_to_hbm [thread:$0]  %s173_s10, 128, %s369_s5, [#allocation6]  }
 0x109   :  { %307 = dma.done.wait [#allocation6], 128  }
 0x10a   :  { %308 = vsyncadd [#allocation6], 4294967168 }
 0x10b   :  { %179 = vsyncpa [#allocation5], 1 }
 0x10c   :  { %180 = vsyncpa [#allocation8], 1 }
 0x10d   :  { %181 = vsyncpa [#allocation6], 1 }

</bundles_post_ra>
